<compile_context>
chip_gen: v5e
topology: v5e:2x2
jax: 0.10.0
libtpu: 0.0.40
codegen_flags: <defaults>
</compile_context>

<pallas_src>
import functools
import math

import jax
import jax.numpy as jnp
from jax.experimental import pallas as pl
from jax.experimental.pallas import tpu as pltpu


def _ceil_to(x, m):
    return (x + m - 1) // m * m


def _apply_act(h, act):
    if act == "relu":
        return jnp.maximum(h, 0.0)
    if act == "elu":
        return jnp.where(h > 0, h, jnp.expm1(jnp.minimum(h, 0.0)))
    if act == "tanh":
        return jnp.tanh(h)
    if act == "sigmoid":
        return jax.nn.sigmoid(h)
    raise ValueError(f"unsupported activation: {act}")


# ----------------------------- Pallas kernel ---------------------------------
def _mlp_tower_kernel(*refs, n_lin, act):
    """Fused MLP tower: (Linear -> act) * (n_lin - 1) -> Linear, in one kernel.

    refs = (x_ref, w0, b0, w1, b1, ..., w_{n_lin-1}, b_{n_lin-1}, o_ref)
    x and weights are bf16; accumulation is f32 on the MXU; all intermediates
    stay in vregs/VMEM (no HBM round trips between layers).
    """
    x_ref = refs[0]
    o_ref = refs[-1]
    wb = refs[1:-1]

    h = x_ref[...]                                    # (TM, K) bf16
    for l in range(n_lin):
        w = wb[2 * l][...]                            # (Kp, Np) bf16
        b = wb[2 * l + 1][...]                        # (1, Np)  f32
        lhs = h if l == 0 else h.astype(jnp.bfloat16)  # layer 0: already bf16
        h = jnp.dot(lhs, w, preferred_element_type=jnp.float32) + b
        if l < n_lin - 1:
            h = _apply_act(h, act)
    o_ref[...] = h.astype(o_ref.dtype)


# ----------------------------- parameters ------------------------------------
def init_mlp_params(key, input_dim, output_dim, hidden_dims,
                    num_hidden_layers=1, act="relu"):
    """Mirrors the PyTorch MLP constructor (nn.Linear default init)."""
    if isinstance(hidden_dims, int):
        hidden_dims = [hidden_dims] * num_hidden_layers
    assert len(hidden_dims) == num_hidden_layers
    dims = [input_dim] + list(hidden_dims) + [output_dim]
    layers = []
    for d_in, d_out in zip(dims[:-1], dims[1:]):
        key, kw, kb = jax.random.split(key, 3)
        bound = 1.0 / math.sqrt(d_in)
        w = jax.random.uniform(kw, (d_in, d_out), jnp.float32, -bound, bound)
        b = jax.random.uniform(kb, (d_out,), jnp.float32, -bound, bound)
        layers.append({"w": w, "b": b})
    return {"layers": layers, "dims": dims, "act": act}


def pack_padded_params(params, lane_multiple=256):
    """One-time packing into lane-dense bf16 weight slabs.

    Invariant (why zero-padding is exact): each layer's padded K rows are zero,
    so whatever sits in the previous layer's padded output lanes (zero for
    relu/elu/tanh, 0.5 for sigmoid!) contributes nothing to the next dot.
    The final layer has no activation and zero bias padding, so its padded
    output lanes are exactly zero and are sliced away by the wrapper.

    Layer 0 keeps its true K (x is passed with a full-extent K block, no pad);
    every later layer's K is padded to the previous layer's padded N.
    N is padded to multiples of 256 to feed the full 2x256^2 MXU (v6e/v7x).
    """
    packed = []
    prev_np = None
    for idx, layer in enumerate(params["layers"]):
        w, b = layer["w"], layer["b"]
        K, N = w.shape
        Kp = K if idx == 0 else prev_np
        Np = _ceil_to(N, lane_multiple)
        wp = jnp.zeros((Kp, Np), jnp.float32).at[:K, :N].set(w).astype(jnp.bfloat16)
        bp = jnp.zeros((1, Np), jnp.float32).at[0, :N].set(b)
        packed.append((wp, bp))
        prev_np = Np
    return packed


# ----------------------------- forward ----------------------------------------
@functools.partial(jax.jit, static_argnames=("act", "out_dim", "single_buffer"))
def _mlp_forward_impl(packed, x, *, act, out_dim, single_buffer):
    M, K = x.shape
    n_lin = len(packed)
    assert packed[0][0].shape[0] == K, "layer-0 weight K must match input dim"
    Np_last = packed[-1][0].shape[1]

    # ---- Row tiling: cap 512, split into >=2 "parallel" steps when possible
    # (v7x has 2 TensorCores; a 1-step grid leaves one idle).
    M8 = _ceil_to(M, 8)
    n_steps = max(1, pl.cdiv(M8, 512))
    if n_steps == 1 and M8 >= 256:
        n_steps = 2
    TM = _ceil_to(pl.cdiv(M8, n_steps), 8)
    Mp = TM * n_steps

    # ---- Stage x in bf16 (halves input DMA bytes); pad rows only if needed.
    xb = x.astype(jnp.bfloat16)
    if Mp != M:
        xb = jnp.pad(xb, ((0, Mp - M), (0, 0)))

    # ---- BlockSpecs: x/out tiled over rows; weights/biases resident full-extent.
    def _resident_spec(shape):
        if single_buffer:
            return pl.BlockSpec(shape, lambda i: (0, 0),
                                pipeline_mode=pl.Buffered(1))
        return pl.BlockSpec(shape, lambda i: (0, 0))

    in_specs = [pl.BlockSpec((TM, K), lambda i: (i, 0))]
    flat_args = [xb]
    for wp, bp in packed:
        in_specs.append(_resident_spec(wp.shape))
        in_specs.append(_resident_spec(bp.shape))
        flat_args.extend([wp, bp])

    # ---- VMEM budget / residency guard (v7x: 64 MiB per TC, weights replicated
    # into each TC under the "parallel" axis).
    w_bytes = sum(int(wp.size) * wp.dtype.itemsize for wp, _ in packed)
    b_bytes = sum(int(bp.size) * bp.dtype.itemsize for _, bp in packed)
    wt_bufs = 1 if single_buffer else 2
    max_np = max(wp.shape[1] for wp, _ in packed)
    act_bytes = 2 * TM * max_np * 4                 # f32 accum + bf16 cast headroom
    io_bytes = 2 * TM * K * 2 + 2 * TM * Np_last * 4  # double-buffered x / out
    vmem_needed = wt_bufs * (w_bytes + b_bytes) + act_bytes + io_bytes
    # TODO(synk): for towers whose resident weights exceed the budget, fall back
    # to an N-tiled grid with a K-reduction accumulator (pl.when init/finalize).
    assert vmem_needed <= 48 * 2 ** 20, (
        "MLP tower too large for the resident-weight fused kernel "
        f"({vmem_needed / 2**20:.1f} MiB needed)")
    vmem_limit = int(min(56 * 2 ** 20, max(2 * vmem_needed, 16 * 2 ** 20)))

    # ---- Cost estimate so XLA schedules the surrounding cast/slice sensibly.
    flops = sum(2 * Mp * wp.shape[0] * wp.shape[1] for wp, _ in packed)
    transc = 0
    if act in ("elu", "tanh", "sigmoid"):
        transc = sum(Mp * wp.shape[1] for wp, _ in packed[:-1])
    bytes_accessed = Mp * K * 2 + w_bytes + b_bytes + Mp * Np_last * 4
    cost = pl.CostEstimate(flops=flops, transcendentals=transc,
                           bytes_accessed=bytes_accessed)

    out = pl.pallas_call(
        functools.partial(_mlp_tower_kernel, n_lin=n_lin, act=act),
        out_shape=jax.ShapeDtypeStruct((Mp, Np_last), jnp.float32),
        grid=(Mp // TM,),
        in_specs=in_specs,
        out_specs=pl.BlockSpec((TM, Np_last), lambda i: (i, 0)),
        compiler_params=pltpu.CompilerParams(
            dimension_semantics=("parallel",),
            vmem_limit_bytes=vmem_limit),
        cost_estimate=cost,
    )(*flat_args)

    # Single slice at the end (lane-dense slab -> true output width).
    return out[:M, :out_dim]


def mlp_forward(packed, x, *, act, out_dim):
    """Prefer single-buffered resident weights; fall back if unsupported."""
    try:
        return _mlp_forward_impl(packed, x, act=act, out_dim=out_dim,
                                 single_buffer=True)
    except Exception:
        return _mlp_forward_impl(packed, x, act=act, out_dim=out_dim,
                                 single_buffer=False)


# ----------------------------- pure-JAX reference -----------------------------
def mlp_reference(params, x):
    h = x
    n_lin = len(params["layers"])
    for l, layer in enumerate(params["layers"]):
        h = h @ layer["w"] + layer["b"]
        if l < n_lin - 1:
            h = _apply_act(h, params["act"])
    return h


# ----------------------------- main --------------------------------------------
if __name__ == "__main__":
    key = jax.random.PRNGKey(0)
    k_param, k_x = jax.random.split(key)

    # Small shapes consistent with the module: MLP(32 -> [64, 64] -> 16), batch=8.
    batch, input_dim, hidden_dim, num_hidden_layers, output_dim = 8, 32, 64, 2, 16
    act = "relu"

    params = init_mlp_params(k_param, input_dim, output_dim, hidden_dim,
                             num_hidden_layers, act=act)
    packed = pack_padded_params(params)   # one-time lane-dense bf16 weight slabs

    x = jax.random.normal(k_x, (batch, input_dim), jnp.float32)

    y = mlp_forward(packed, x, act=act, out_dim=output_dim)
    y = jax.block_until_ready(y)

    y_ref = mlp_reference(params, x)

    assert y.shape == (batch, output_dim)
    assert bool(jnp.all(jnp.isfinite(y)))
    # bf16 MXU inputs with f32 accumulation -> loose tolerance vs. the f32 reference.
    max_err = float(jnp.max(jnp.abs(y - y_ref)))
    assert bool(jnp.allclose(y, y_ref, rtol=5e-2, atol=5e-2)), max_err

    print("KERNEL_OK")
</pallas_src>

<mosaic_0001>
module attributes {stable_mosaic.version = 11 : i64} {
  func.func @_mlp_tower_kernel(%arg0: i32, %arg1: memref<8x32xbf16, #tpu.memory_space<vmem>>, %arg2: memref<32x256xbf16, #tpu.memory_space<vmem>>, %arg3: memref<1x256xf32, #tpu.memory_space<vmem>>, %arg4: memref<256x256xbf16, #tpu.memory_space<vmem>>, %arg5: memref<1x256xf32, #tpu.memory_space<vmem>>, %arg6: memref<256x256xbf16, #tpu.memory_space<vmem>>, %arg7: memref<1x256xf32, #tpu.memory_space<vmem>>, %arg8: memref<8x256xf32, #tpu.memory_space<vmem>>) attributes {dimension_semantics = [#tpu.dimension_semantics<parallel>], iteration_bounds = array<i64: 1>, scalar_prefetch = 0 : i64, scratch_operands = 0 : i64, tpu.core_type = #tpu.core_type<tc>, window_params = [{transform_indices = @transform_0, window_bounds = array<i64: 8, 32>}, {pipeline_mode = #tpu.pipeline_mode<synchronous>, transform_indices = @transform_1, window_bounds = array<i64: 32, 256>}, {pipeline_mode = #tpu.pipeline_mode<synchronous>, transform_indices = @transform_2, window_bounds = array<i64: 1, 256>}, {pipeline_mode = #tpu.pipeline_mode<synchronous>, transform_indices = @transform_3, window_bounds = array<i64: 256, 256>}, {pipeline_mode = #tpu.pipeline_mode<synchronous>, transform_indices = @transform_4, window_bounds = array<i64: 1, 256>}, {pipeline_mode = #tpu.pipeline_mode<synchronous>, transform_indices = @transform_5, window_bounds = array<i64: 256, 256>}, {pipeline_mode = #tpu.pipeline_mode<synchronous>, transform_indices = @transform_6, window_bounds = array<i64: 1, 256>}, {transform_indices = @transform_7, window_bounds = array<i64: 8, 256>}]} {
    %c0 = arith.constant 0 : index
    %c0_0 = arith.constant 0 : index
    %0 = vector.load %arg1[%c0, %c0_0] : memref<8x32xbf16, #tpu.memory_space<vmem>>, vector<8x32xbf16>
    %c0_1 = arith.constant 0 : index
    %c0_2 = arith.constant 0 : index
    %1 = vector.load %arg2[%c0_1, %c0_2] : memref<32x256xbf16, #tpu.memory_space<vmem>>, vector<32x256xbf16>
    %c0_3 = arith.constant 0 : index
    %c0_4 = arith.constant 0 : index
    %2 = vector.load %arg3[%c0_3, %c0_4] : memref<1x256xf32, #tpu.memory_space<vmem>>, vector<1x256xf32>
    %cst = arith.constant dense<0.000000e+00> : vector<8x256xf32>
    %3 = tpu.matmul %0, %1, %cst {dimension_numbers = #tpu.dot_dimension_numbers<[1], [0], [0], [1], [0, 0, 1, 1], [], []>} : vector<8x32xbf16>, vector<32x256xbf16>, vector<8x256xf32> -> vector<8x256xf32>
    %4 = vector.broadcast %2 : vector<1x256xf32> to vector<8x256xf32>
    %5 = arith.addf %3, %4 : vector<8x256xf32>
    %cst_5 = arith.constant 0.000000e+00 : f32
    %6 = vector.broadcast %cst_5 : f32 to vector<8x256xf32>
    %7 = arith.maximumf %5, %6 : vector<8x256xf32>
    %c0_6 = arith.constant 0 : index
    %c0_7 = arith.constant 0 : index
    %8 = vector.load %arg4[%c0_6, %c0_7] : memref<256x256xbf16, #tpu.memory_space<vmem>>, vector<256x256xbf16>
    %c0_8 = arith.constant 0 : index
    %c0_9 = arith.constant 0 : index
    %9 = vector.load %arg5[%c0_8, %c0_9] : memref<1x256xf32, #tpu.memory_space<vmem>>, vector<1x256xf32>
    %10 = arith.truncf %7 : vector<8x256xf32> to vector<8x256xbf16>
    %cst_10 = arith.constant dense<0.000000e+00> : vector<8x256xf32>
    %11 = tpu.matmul %10, %8, %cst_10 {dimension_numbers = #tpu.dot_dimension_numbers<[1], [0], [0], [1], [0, 0, 1, 1], [], []>} : vector<8x256xbf16>, vector<256x256xbf16>, vector<8x256xf32> -> vector<8x256xf32>
    %12 = vector.broadcast %9 : vector<1x256xf32> to vector<8x256xf32>
    %13 = arith.addf %11, %12 : vector<8x256xf32>
    %cst_11 = arith.constant 0.000000e+00 : f32
    %14 = vector.broadcast %cst_11 : f32 to vector<8x256xf32>
    %15 = arith.maximumf %13, %14 : vector<8x256xf32>
    %c0_12 = arith.constant 0 : index
    %c0_13 = arith.constant 0 : index
    %16 = vector.load %arg6[%c0_12, %c0_13] : memref<256x256xbf16, #tpu.memory_space<vmem>>, vector<256x256xbf16>
    %c0_14 = arith.constant 0 : index
    %c0_15 = arith.constant 0 : index
    %17 = vector.load %arg7[%c0_14, %c0_15] : memref<1x256xf32, #tpu.memory_space<vmem>>, vector<1x256xf32>
    %18 = arith.truncf %15 : vector<8x256xf32> to vector<8x256xbf16>
    %cst_16 = arith.constant dense<0.000000e+00> : vector<8x256xf32>
    %19 = tpu.matmul %18, %16, %cst_16 {dimension_numbers = #tpu.dot_dimension_numbers<[1], [0], [0], [1], [0, 0, 1, 1], [], []>} : vector<8x256xbf16>, vector<256x256xbf16>, vector<8x256xf32> -> vector<8x256xf32>
    %20 = vector.broadcast %17 : vector<1x256xf32> to vector<8x256xf32>
    %21 = arith.addf %19, %20 : vector<8x256xf32>
    %c0_17 = arith.constant 0 : index
    %c0_18 = arith.constant 0 : index
    %22 = vector.load %arg8[%c0_17, %c0_18] : memref<8x256xf32, #tpu.memory_space<vmem>>, vector<8x256xf32>
    tpu.vector_store %arg8[%c0_17, %c0_18], %21 {strides = array<i32>} : memref<8x256xf32, #tpu.memory_space<vmem>>, vector<8x256xf32>,
    return
  }
  func.func @transform_0(%arg0: i32) -> (i32, i32) {
    %c0_i32 = arith.constant 0 : i32
    %c0_i32_0 = arith.constant 0 : i32
    return %arg0, %c0_i32 : i32, i32
  }
  func.func @transform_1(%arg0: i32) -> (i32, i32) {
    %c0_i32 = arith.constant 0 : i32
    %c0_i32_0 = arith.constant 0 : i32
    %c0_i32_1 = arith.constant 0 : i32
    return %c0_i32, %c0_i32_0 : i32, i32
  }
  func.func @transform_2(%arg0: i32) -> (i32, i32) {
    %c0_i32 = arith.constant 0 : i32
    %c0_i32_0 = arith.constant 0 : i32
    %c0_i32_1 = arith.constant 0 : i32
    return %c0_i32, %c0_i32_0 : i32, i32
  }
  func.func @transform_3(%arg0: i32) -> (i32, i32) {
    %c0_i32 = arith.constant 0 : i32
    %c0_i32_0 = arith.constant 0 : i32
    %c0_i32_1 = arith.constant 0 : i32
    return %c0_i32, %c0_i32_0 : i32, i32
  }
  func.func @transform_4(%arg0: i32) -> (i32, i32) {
    %c0_i32 = arith.constant 0 : i32
    %c0_i32_0 = arith.constant 0 : i32
    %c0_i32_1 = arith.constant 0 : i32
    return %c0_i32, %c0_i32_0 : i32, i32
  }
  func.func @transform_5(%arg0: i32) -> (i32, i32) {
    %c0_i32 = arith.constant 0 : i32
    %c0_i32_0 = arith.constant 0 : i32
    %c0_i32_1 = arith.constant 0 : i32
    return %c0_i32, %c0_i32_0 : i32, i32
  }
  func.func @transform_6(%arg0: i32) -> (i32, i32) {
    %c0_i32 = arith.constant 0 : i32
    %c0_i32_0 = arith.constant 0 : i32
    %c0_i32_1 = arith.constant 0 : i32
    return %c0_i32, %c0_i32_0 : i32, i32
  }
  func.func @transform_7(%arg0: i32) -> (i32, i32) {
    %c0_i32 = arith.constant 0 : i32
    %c0_i32_0 = arith.constant 0 : i32
    return %arg0, %c0_i32 : i32, i32
  }
}

module attributes {stable_mosaic.version = 11 : i64} {
  func.func @_mlp_tower_kernel(%arg0: i32, %arg1: memref<8x32xbf16, #tpu.memory_space<vmem>>, %arg2: memref<32x256xbf16, #tpu.memory_space<vmem>>, %arg3: memref<1x256xf32, #tpu.memory_space<vmem>>, %arg4: memref<256x256xbf16, #tpu.memory_space<vmem>>, %arg5: memref<1x256xf32, #tpu.memory_space<vmem>>, %arg6: memref<256x256xbf16, #tpu.memory_space<vmem>>, %arg7: memref<1x256xf32, #tpu.memory_space<vmem>>, %arg8: memref<8x256xf32, #tpu.memory_space<vmem>>) attributes {dimension_semantics = [#tpu.dimension_semantics<parallel>], iteration_bounds = array<i64: 1>, scalar_prefetch = 0 : i64, scratch_operands = 0 : i64, tpu.core_type = #tpu.core_type<tc>, window_params = [{transform_indices = @transform_0, window_bounds = array<i64: 8, 32>}, {pipeline_mode = #tpu.pipeline_mode<synchronous>, transform_indices = @transform_1, window_bounds = array<i64: 32, 256>}, {pipeline_mode = #tpu.pipeline_mode<synchronous>, transform_indices = @transform_2, window_bounds = array<i64: 1, 256>}, {pipeline_mode = #tpu.pipeline_mode<synchronous>, transform_indices = @transform_3, window_bounds = array<i64: 256, 256>}, {pipeline_mode = #tpu.pipeline_mode<synchronous>, transform_indices = @transform_4, window_bounds = array<i64: 1, 256>}, {pipeline_mode = #tpu.pipeline_mode<synchronous>, transform_indices = @transform_5, window_bounds = array<i64: 256, 256>}, {pipeline_mode = #tpu.pipeline_mode<synchronous>, transform_indices = @transform_6, window_bounds = array<i64: 1, 256>}, {transform_indices = @transform_7, window_bounds = array<i64: 8, 256>}]} {
    %c0 = arith.constant 0 : index
    %c0_0 = arith.constant 0 : index
    %0 = vector.load %arg1[%c0, %c0_0] : memref<8x32xbf16, #tpu.memory_space<vmem>>, vector<8x32xbf16>
    %c0_1 = arith.constant 0 : index
    %c0_2 = arith.constant 0 : index
    %1 = vector.load %arg2[%c0_1, %c0_2] : memref<32x256xbf16, #tpu.memory_space<vmem>>, vector<32x256xbf16>
    %c0_3 = arith.constant 0 : index
    %c0_4 = arith.constant 0 : index
    %2 = vector.load %arg3[%c0_3, %c0_4] : memref<1x256xf32, #tpu.memory_space<vmem>>, vector<1x256xf32>
    %cst = arith.constant dense<0.000000e+00> : vector<8x256xf32>
    %3 = tpu.matmul %0, %1, %cst {dimension_numbers = #tpu.dot_dimension_numbers<[1], [0], [0], [1], [0, 0, 1, 1], [], []>} : vector<8x32xbf16>, vector<32x256xbf16>, vector<8x256xf32> -> vector<8x256xf32>
    %4 = vector.broadcast %2 : vector<1x256xf32> to vector<8x256xf32>
    %5 = arith.addf %3, %4 : vector<8x256xf32>
    %cst_5 = arith.constant 0.000000e+00 : f32
    %6 = vector.broadcast %cst_5 : f32 to vector<8x256xf32>
    %7 = arith.maximumf %5, %6 : vector<8x256xf32>
    %c0_6 = arith.constant 0 : index
    %c0_7 = arith.constant 0 : index
    %8 = vector.load %arg4[%c0_6, %c0_7] : memref<256x256xbf16, #tpu.memory_space<vmem>>, vector<256x256xbf16>
    %c0_8 = arith.constant 0 : index
    %c0_9 = arith.constant 0 : index
    %9 = vector.load %arg5[%c0_8, %c0_9] : memref<1x256xf32, #tpu.memory_space<vmem>>, vector<1x256xf32>
    %10 = arith.truncf %7 : vector<8x256xf32> to vector<8x256xbf16>
    %cst_10 = arith.constant dense<0.000000e+00> : vector<8x256xf32>
    %11 = tpu.matmul %10, %8, %cst_10 {dimension_numbers = #tpu.dot_dimension_numbers<[1], [0], [0], [1], [0, 0, 1, 1], [], []>} : vector<8x256xbf16>, vector<256x256xbf16>, vector<8x256xf32> -> vector<8x256xf32>
    %12 = vector.broadcast %9 : vector<1x256xf32> to vector<8x256xf32>
    %13 = arith.addf %11, %12 : vector<8x256xf32>
    %cst_11 = arith.constant 0.000000e+00 : f32
    %14 = vector.broadcast %cst_11 : f32 to vector<8x256xf32>
    %15 = arith.maximumf %13, %14 : vector<8x256xf32>
    %c0_12 = arith.constant 0 : index
    %c0_13 = arith.constant 0 : index
    %16 = vector.load %arg6[%c0_12, %c0_13] : memref<256x256xbf16, #tpu.memory_space<vmem>>, vector<256x256xbf16>
    %c0_14 = arith.constant 0 : index
    %c0_15 = arith.constant 0 : index
    %17 = vector.load %arg7[%c0_14, %c0_15] : memref<1x256xf32, #tpu.memory_space<vmem>>, vector<1x256xf32>
    %18 = arith.truncf %15 : vector<8x256xf32> to vector<8x256xbf16>
    %cst_16 = arith.constant dense<0.000000e+00> : vector<8x256xf32>
    %19 = tpu.matmul %18, %16, %cst_16 {dimension_numbers = #tpu.dot_dimension_numbers<[1], [0], [0], [1], [0, 0, 1, 1], [], []>} : vector<8x256xbf16>, vector<256x256xbf16>, vector<8x256xf32> -> vector<8x256xf32>
    %20 = vector.broadcast %17 : vector<1x256xf32> to vector<8x256xf32>
    %21 = arith.addf %19, %20 : vector<8x256xf32>
    %c0_17 = arith.constant 0 : index
    %c0_18 = arith.constant 0 : index
    %22 = vector.load %arg8[%c0_17, %c0_18] : memref<8x256xf32, #tpu.memory_space<vmem>>, vector<8x256xf32>
    tpu.vector_store %arg8[%c0_17, %c0_18], %21 {strides = array<i32>} : memref<8x256xf32, #tpu.memory_space<vmem>>, vector<8x256xf32>,
    return
  }
  func.func @transform_0(%arg0: i32) -> (i32, i32) {
    %c0_i32 = arith.constant 0 : i32
    %c0_i32_0 = arith.constant 0 : i32
    return %arg0, %c0_i32 : i32, i32
  }
  func.func @transform_1(%arg0: i32) -> (i32, i32) {
    %c0_i32 = arith.constant 0 : i32
    %c0_i32_0 = arith.constant 0 : i32
    %c0_i32_1 = arith.constant 0 : i32
    return %c0_i32, %c0_i32_0 : i32, i32
  }
  func.func @transform_2(%arg0: i32) -> (i32, i32) {
    %c0_i32 = arith.constant 0 : i32
    %c0_i32_0 = arith.constant 0 : i32
    %c0_i32_1 = arith.constant 0 : i32
    return %c0_i32, %c0_i32_0 : i32, i32
  }
  func.func @transform_3(%arg0: i32) -> (i32, i32) {
    %c0_i32 = arith.constant 0 : i32
    %c0_i32_0 = arith.constant 0 : i32
    %c0_i32_1 = arith.constant 0 : i32
    return %c0_i32, %c0_i32_0 : i32, i32
  }
  func.func @transform_4(%arg0: i32) -> (i32, i32) {
    %c0_i32 = arith.constant 0 : i32
    %c0_i32_0 = arith.constant 0 : i32
    %c0_i32_1 = arith.constant 0 : i32
    return %c0_i32, %c0_i32_0 : i32, i32
  }
  func.func @transform_5(%arg0: i32) -> (i32, i32) {
    %c0_i32 = arith.constant 0 : i32
    %c0_i32_0 = arith.constant 0 : i32
    %c0_i32_1 = arith.constant 0 : i32
    return %c0_i32, %c0_i32_0 : i32, i32
  }
  func.func @transform_6(%arg0: i32) -> (i32, i32) {
    %c0_i32 = arith.constant 0 : i32
    %c0_i32_0 = arith.constant 0 : i32
    %c0_i32_1 = arith.constant 0 : i32
    return %c0_i32, %c0_i32_0 : i32, i32
  }
  func.func @transform_7(%arg0: i32) -> (i32, i32) {
    %c0_i32 = arith.constant 0 : i32
    %c0_i32_0 = arith.constant 0 : i32
    return %arg0, %c0_i32 : i32, i32
  }
}

</mosaic_0001>

<bundles_post_ra>
// kernel: _mlp_forward_impl.1
= control target key start
LH: loop header
LB: loop body
LE: loop exit
PB: predicated region body
PF: predicated region fallthrough
CT: control target
= control target key end

     0   :  { %12 = vsyncpa [#allocation3], 0  ;;  %s1148_s0 = inlined_call_operand.vmem [shape: bf16[8,32], index: 0, kind: input, shape index: {}]   ;;  %s1149_s1 = inlined_call_operand.hbm [shape: bf16[32,256], index: 1, kind: input, shape index: {}]   ;;  %s1150_s2 = inlined_call_operand.vmem [shape: f32[1,256], index: 2, kind: input, shape index: {}]   ;;  %s1151_s3 = inlined_call_operand.hbm [shape: bf16[256,256], index: 3, kind: input, shape index: {}]   ;;  %s1152_s4 = inlined_call_operand.vmem [shape: f32[1,256], index: 4, kind: input, shape index: {}]   ;;  %s1153_s5 = inlined_call_operand.hbm [shape: bf16[256,256], index: 5, kind: input, shape index: {}]   ;;  %s1154_s6 = inlined_call_operand.vmem [shape: f32[1,256], index: 6, kind: input, shape index: {}]   ;;  %s1155_s7 = inlined_call_operand.vmem [shape: f32[8,256], index: 7, kind: output, shape index: {}]  }
   0x1   :  { %13 = vsyncpa [#allocation5], 0  ;;  %s35_s26 = sshll.u32 %s1151_s3, 4  ;;  %s1074_s27 = smov [#allocation4]   ;;  %s36_s26 = int_to_ptr.hbm [resolvable:$true] %s35_s26 }
   0x2   :  { %s37_s28 = sshll.u32 %s1074_s27, 4  ;;  %s20_s8 = sshll.u32 %s1149_s1, 4  ;;  %s38_s28 = int_to_ptr.vmem [resolvable:$true] %s37_s28  ;;  %s21_s8 = int_to_ptr.hbm [resolvable:$true] %s20_s8 }
   0x3   :  { %s1075_s9 = smov 128   ;;  %s1076_s10 = smov 8  }
   0x4   :  { %43 = dma.hbm_to_vmem [thread:$0]  %s36_s26, 4096, %s38_s28, [#allocation5], %s1075_s9, %s1075_s9, %s1076_s10  }
   0x5   :  { %s1077_s11 = smov [#allocation2]   ;;  %s50_s15 = sshll.u32 %s1153_s5, 4  ;;  %s51_s15 = int_to_ptr.hbm [resolvable:$true] %s50_s15 }
   0x6   :  { %s22_s12 = sshll.u32 %s1077_s11, 4  ;;  %s1078_s3 = smov [#allocation6]   ;;  %s23_s12 = int_to_ptr.vmem [resolvable:$true] %s22_s12 }
   0x7   :  { %28 = dma.hbm_to_vmem [thread:$0]  %s21_s8, 512, %s23_s12, [#allocation3], %s1075_s9, %s1075_s9, %s1076_s10  }
   0x8   :  { %s52_s16 = sshll.u32 %s1078_s3, 4  ;;  %s53_s16 = int_to_ptr.vmem [resolvable:$true] %s52_s16 }
   0x9   :  { %58 = dma.hbm_to_vmem [thread:$0]  %s51_s15, 4096, %s53_s16, [#allocation5], %s1075_s9, %s1075_s9, %s1076_s10  }
   0xa   :  { %1070 = dma.done.wait [#allocation3], 512  }
   0xb   :  { %1071 = vsyncadd [#allocation3], 4294966784 }
   0xc   :  { %1072 = dma.done.wait [#allocation5], 8192  }
   0xd   :  { %1073 = vsyncadd [#allocation5], 4294959104  ;;  %v661_v0 = vld [vmem:[#allocation2 + $0x10] sm:$0xf]  ;;  %v928_v1 = vld [vmem:[#allocation2 + $0x14] sm:$0xf0] }
   0xe   :  { %v927_v2 = vld [vmem:[#allocation2 + $0x14] sm:$0xf]  ;;  %v662_v3 = vor.u32 %v928_v1, %v661_v0  ;;  %v663_v4 = vld [vmem:[#allocation2 + $0x18] sm:$0xf0]  ;;  %v653_v5 = vld [vmem:[#allocation2] sm:$0xf] }
   0xf   :  { %v926_v6 = vld [vmem:[#allocation2 + $0x4] sm:$0xf0]  ;;  %v666_v7 = vor.u32 %v927_v2, %v663_v4  ;;  %v925_v8 = vld [vmem:[#allocation2 + $0x4] sm:$0xf]  ;;  %v655_v9 = vld [vmem:[#allocation2 + $0x8] sm:$0xf0] }
  0x10   :  { %vm105_vm0 = vcmask 261120   ;;  %115 = vmatpush.bf16.msra.mxu0 %v662_v3  ;;  %v654_v10 = vor.u32 %v926_v6, %v653_v5  ;;  %v727_v11 = vld [vmem:[#allocation4 + $0x70] sm:$0xf]  ;;  %v944_v12 = vld [vmem:[#allocation4 + $0x74] sm:$0xf0]  ;;  %v658_v14 = vor.u32 %v925_v8, %v655_v9 }
  0x11   :  { %v791_v13 = vld [vmem:[#allocation4 + $0xf0] sm:$0xf]  ;;  %128 = vmatpush.bf16.msra.mxu1 %v666_v7  ;;  %v728_v15 = vor.u32 %v944_v12, %v727_v11  ;;  %v960_v16 = vld [vmem:[#allocation4 + $0xf4] sm:$0xf0]  ;;  %v943_v17 = vld [vmem:[#allocation4 + $0x74] sm:$0xf] }
  0x12   :  { %v729_v18 = vld [vmem:[#allocation4 + $0x78] sm:$0xf0]  ;;  %v74_v19 = vld [vmem:[%s1148_s0] sm:$0xf]  ;;  %v792_v20 = vor.u32 %v960_v16, %v791_v13  ;;  %v959_v22 = vld [vmem:[#allocation4 + $0xf4] sm:$0xf] }
  0x13   :  { %v732_v21 = vor.u32 %v943_v17, %v729_v18  ;;  %v793_v23 = vld [vmem:[#allocation4 + $0xf8] sm:$0xf0]  ;;  %v719_v24 = vld [vmem:[#allocation4 + $0x60] sm:$0xf]  ;;  %337 = vmatpush.bf16.msra.mxu2 %v728_v15  ;;  %v942_v26 = vld [vmem:[#allocation4 + $0x64] sm:$0xf0] }
  0x14   :  { %v796_v25 = vor.u32 %v959_v22, %v793_v23  ;;  %v783_v27 = vld [vmem:[#allocation4 + $0xe0] sm:$0xf]  ;;  %v958_v28 = vld [vmem:[#allocation4 + $0xe4] sm:$0xf0]  ;;  %116 = vmatpush.bf16.msra.mxu0 %v654_v10  ;;  %350 = vmatpush.bf16.msra.mxu3 %v792_v20  ;;  %v720_v29 = vor.u32 %v942_v26, %v719_v24  ;;  %v941_v31 = vld [vmem:[#allocation4 + $0x64] sm:$0xf] }
  0x15   :  { %v784_v30 = vor.u32 %v958_v28, %v783_v27  ;;  %v721_v32 = vld [vmem:[#allocation4 + $0x68] sm:$0xf0]  ;;  %v957_v33 = vld [vmem:[#allocation4 + $0xe4] sm:$0xf]  ;;  %129 = vmatpush.bf16.msra.mxu1 %v658_v14  ;;  %v711_v36 = vld [vmem:[#allocation4 + $0x50] sm:$0xf] }
  0x16   :  { %v724_v34 = vor.u32 %v941_v31, %v721_v32  ;;  %v785_v35 = vld [vmem:[#allocation4 + $0xe8] sm:$0xf0]  ;;  %v940_v37 = vld [vmem:[#allocation4 + $0x54] sm:$0xf0]  ;;  %v775_v39 = vld [vmem:[#allocation4 + $0xd0] sm:$0xf] }
  0x17   :  { %v788_v38 = vor.u32 %v957_v33, %v785_v35  ;;  %v956_v40 = vld [vmem:[#allocation4 + $0xd4] sm:$0xf0]  ;;  %v939_v41 = vld [vmem:[#allocation4 + $0x54] sm:$0xf]  ;;  %667 = vmatmul.msk.bf16.vlgmr.msra.gmra.mxu0 %vm105_vm0, %v74_v19  ;;  %338 = vmatpush.bf16.msra.mxu2 %v720_v29  ;;  %v712_v42 = vor.u32 %v940_v37, %v711_v36  ;;  %v713_v43 = vld [vmem:[#allocation4 + $0x58] sm:$0xf0] }
  0x18   :  { %363 = vmatpush.bf16.msrb.mxu0 %v732_v21  ;;  %v955_v44 = vld [vmem:[#allocation4 + $0xd4] sm:$0xf]  ;;  %v777_v45 = vld [vmem:[#allocation4 + $0xd8] sm:$0xf0]  ;;  %668 = vmatmul.msk.bf16.vlgmr.msra.gmra.mxu1 %vm105_vm0, %v74_v19  ;;  %v776_v46 = vor.u32 %v956_v40, %v775_v39  ;;  %v703_v47 = vld [vmem:[#allocation4 + $0x40] sm:$0xf]  ;;  %v716_v49 = vor.u32 %v939_v41, %v713_v43 }
  0x19   :  { %376 = vmatpush.bf16.msrb.mxu1 %v796_v25  ;;  %351 = vmatpush.bf16.msra.mxu3 %v784_v30  ;;  %v938_v48 = vld [vmem:[#allocation4 + $0x44] sm:$0xf0]  ;;  %v767_v50 = vld [vmem:[#allocation4 + $0xc0] sm:$0xf]  ;;  %v780_v52 = vor.u32 %v955_v44, %v777_v45  ;;  %v937_v53 = vld [vmem:[#allocation4 + $0x44] sm:$0xf] }
  0x1a   :  { %v954_v51 = vld [vmem:[#allocation4 + $0xc4] sm:$0xf0]  ;;  %v705_v54 = vld [vmem:[#allocation4 + $0x48] sm:$0xf0]  ;;  %v704_v55 = vor.u32 %v938_v48, %v703_v47  ;;  %v953_v56 = vld [vmem:[#allocation4 + $0xc4] sm:$0xf] }
  0x1b   :  { %339 = vmatpush.bf16.msra.mxu2 %v712_v42  ;;  %v769_v57 = vld [vmem:[#allocation4 + $0xc8] sm:$0xf0]  ;;  %v768_v58 = vor.u32 %v954_v51, %v767_v50  ;;  %v695_v59 = vld [vmem:[#allocation4 + $0x30] sm:$0xf]  ;;  %v936_v60 = vld [vmem:[#allocation4 + $0x34] sm:$0xf0]  ;;  %v708_v61 = vor.u32 %v937_v53, %v705_v54 }
  0x1c   :  { %364 = vmatpush.bf16.msrb.mxu0 %v724_v34  ;;  %v759_v62 = vld [vmem:[#allocation4 + $0xb0] sm:$0xf]  ;;  %v952_v63 = vld [vmem:[#allocation4 + $0xb4] sm:$0xf0]  ;;  %v772_v0 = vor.u32 %v953_v56, %v769_v57  ;;  %v935_v1 = vld [vmem:[#allocation4 + $0x34] sm:$0xf]  ;;  %v696_v3 = vor.u32 %v936_v60, %v695_v59 }
  0x1d   :  { %377 = vmatpush.bf16.msrb.mxu1 %v788_v38  ;;  %352 = vmatpush.bf16.msra.mxu3 %v776_v46  ;;  %v697_v2 = vld [vmem:[#allocation4 + $0x38] sm:$0xf0]  ;;  %v951_v4 = vld [vmem:[#allocation4 + $0xb4] sm:$0xf]  ;;  %v760_v6 = vor.u32 %v952_v63, %v759_v62  ;;  %v687_v7 = vld [vmem:[#allocation4 + $0x20] sm:$0xf] }
  0x1e   :  { %v761_v5 = vld [vmem:[#allocation4 + $0xb8] sm:$0xf0]  ;;  %v934_v8 = vld [vmem:[#allocation4 + $0x24] sm:$0xf0]  ;;  %v700_v9 = vor.u32 %v935_v1, %v697_v2  ;;  %v751_v10 = vld [vmem:[#allocation4 + $0xa0] sm:$0xf] }
  0x1f   :  { %340 = vmatpush.bf16.msra.mxu2 %v704_v55  ;;  %v950_v11 = vld [vmem:[#allocation4 + $0xa4] sm:$0xf0]  ;;  %v764_v12 = vor.u32 %v951_v4, %v761_v5  ;;  %v933_v13 = vld [vmem:[#allocation4 + $0x24] sm:$0xf]  ;;  %v689_v14 = vld [vmem:[#allocation4 + $0x28] sm:$0xf0]  ;;  %v688_v15 = vor.u32 %v934_v8, %v687_v7 }
  0x20   :  { %365 = vmatpush.bf16.msrb.mxu0 %v716_v49  ;;  %v949_v16 = vld [vmem:[#allocation4 + $0xa4] sm:$0xf]  ;;  %v753_v17 = vld [vmem:[#allocation4 + $0xa8] sm:$0xf0]  ;;  %v752_v18 = vor.u32 %v950_v11, %v751_v10  ;;  %v692_v19 = vor.u32 %v933_v13, %v689_v14  ;;  %v679_v21 = vld [vmem:[#allocation4 + $0x10] sm:$0xf] }
  0x21   :  { %378 = vmatpush.bf16.msrb.mxu1 %v780_v52  ;;  %353 = vmatpush.bf16.msra.mxu3 %v768_v58  ;;  %v756_v20 = vor.u32 %v949_v16, %v753_v17  ;;  %v932_v22 = vld [vmem:[#allocation4 + $0x14] sm:$0xf0]  ;;  %v743_v23 = vld [vmem:[#allocation4 + $0x90] sm:$0xf]  ;;  %v931_v26 = vld [vmem:[#allocation4 + $0x14] sm:$0xf] }
  0x22   :  { %v680_v24 = vor.u32 %v932_v22, %v679_v21  ;;  %v948_v25 = vld [vmem:[#allocation4 + $0x94] sm:$0xf0]  ;;  %v681_v27 = vld [vmem:[#allocation4 + $0x18] sm:$0xf0]  ;;  %v947_v30 = vld [vmem:[#allocation4 + $0x94] sm:$0xf] }
  0x23   :  { %341 = vmatpush.bf16.msra.mxu2 %v696_v3  ;;  %v744_v28 = vor.u32 %v948_v25, %v743_v23  ;;  %v684_v29 = vor.u32 %v931_v26, %v681_v27  ;;  %v745_v31 = vld [vmem:[#allocation4 + $0x98] sm:$0xf0]  ;;  %v671_v33 = vld [vmem:[#allocation4] sm:$0xf]  ;;  %v930_v34 = vld [vmem:[#allocation4 + $0x4] sm:$0xf0] }
  0x24   :  { %366 = vmatpush.bf16.msrb.mxu0 %v708_v61  ;;  %v748_v32 = vor.u32 %v947_v30, %v745_v31  ;;  %v735_v35 = vld [vmem:[#allocation4 + $0x80] sm:$0xf]  ;;  %v672_v36 = vor.u32 %v930_v34, %v671_v33  ;;  %v946_v37 = vld [vmem:[#allocation4 + $0x84] sm:$0xf0]  ;;  %v929_v38 = vld [vmem:[#allocation4 + $0x4] sm:$0xf] }
  0x25   :  { %379 = vmatpush.bf16.msrb.mxu1 %v772_v0  ;;  %354 = vmatpush.bf16.msra.mxu3 %v760_v6  ;;  %v673_v39 = vld [vmem:[#allocation4 + $0x8] sm:$0xf0]  ;;  %v736_v40 = vor.u32 %v946_v37, %v735_v35  ;;  %v945_v42 = vld [vmem:[#allocation4 + $0x84] sm:$0xf]  ;;  %v919_v45 = vld [vmem:[#allocation6 + $0xf0] sm:$0xf] }
  0x26   :  { %v676_v41 = vor.u32 %v929_v38, %v673_v39  ;;  %v737_v43 = vld [vmem:[#allocation4 + $0x88] sm:$0xf0]  ;;  %v992_v46 = vld [vmem:[#allocation6 + $0xf4] sm:$0xf0]  ;;  %v991_v47 = vld [vmem:[#allocation6 + $0xf4] sm:$0xf] }
  0x27   :  { %342 = vmatpush.bf16.msra.mxu2 %v688_v15  ;;  %v740_v44 = vor.u32 %v945_v42, %v737_v43  ;;  %v920_v48 = vor.u32 %v992_v46, %v919_v45  ;;  %v921_v49 = vld [vmem:[#allocation6 + $0xf8] sm:$0xf0]  ;;  %v911_v50 = vld [vmem:[#allocation6 + $0xe0] sm:$0xf]  ;;  %v990_v51 = vld [vmem:[#allocation6 + $0xe4] sm:$0xf0] }
  0x28   :  { %367 = vmatpush.bf16.msrb.mxu0 %v700_v9  ;;  %v924_v52 = vor.u32 %v991_v47, %v921_v49  ;;  %v989_v53 = vld [vmem:[#allocation6 + $0xe4] sm:$0xf]  ;;  %v913_v54 = vld [vmem:[#allocation6 + $0xe8] sm:$0xf0]  ;;  %v855_v55 = vld [vmem:[#allocation6 + $0x70] sm:$0xf]  ;;  %v912_v56 = vor.u32 %v990_v51, %v911_v50 }
  0x29   :  { %380 = vmatpush.bf16.msrb.mxu1 %v764_v12  ;;  %355 = vmatpush.bf16.msra.mxu3 %v752_v18  ;;  %v976_v57 = vld [vmem:[#allocation6 + $0x74] sm:$0xf0]  ;;  %v975_v58 = vld [vmem:[#allocation6 + $0x74] sm:$0xf]  ;;  %v857_v59 = vld [vmem:[#allocation6 + $0x78] sm:$0xf0]  ;;  %v916_v60 = vor.u32 %v989_v53, %v913_v54 }
  0x2a   :  { %v856_v61 = vor.u32 %v976_v57, %v855_v55  ;;  %v860_v62 = vor.u32 %v975_v58, %v857_v59  ;;  %v903_v63 = vld [vmem:[#allocation6 + $0xd0] sm:$0xf]  ;;  %v988_v0 = vld [vmem:[#allocation6 + $0xd4] sm:$0xf0]  ;;  %v987_v1 = vld [vmem:[#allocation6 + $0xd4] sm:$0xf] }
  0x2b   :  { %343 = vmatpush.bf16.msra.mxu2 %v680_v24  ;;  %v905_v2 = vld [vmem:[#allocation6 + $0xd8] sm:$0xf0]  ;;  %v847_v3 = vld [vmem:[#allocation6 + $0x60] sm:$0xf]  ;;  %v974_v4 = vld [vmem:[#allocation6 + $0x64] sm:$0xf0]  ;;  %v904_v8 = vor.u32 %v988_v0, %v903_v63 }
  0x2c   :  { %368 = vmatpush.bf16.msrb.mxu0 %v692_v19  ;;  %v848_v5 = vor.u32 %v974_v4, %v847_v3  ;;  %v973_v6 = vld [vmem:[#allocation6 + $0x64] sm:$0xf]  ;;  %v849_v7 = vld [vmem:[#allocation6 + $0x68] sm:$0xf0]  ;;  %v895_v10 = vld [vmem:[#allocation6 + $0xc0] sm:$0xf]  ;;  %v908_v12 = vor.u32 %v987_v1, %v905_v2 }
  0x2d   :  { %381 = vmatpush.bf16.msrb.mxu1 %v756_v20  ;;  %356 = vmatpush.bf16.msra.mxu3 %v744_v28  ;;  %v852_v9 = vor.u32 %v973_v6, %v849_v7  ;;  %v986_v11 = vld [vmem:[#allocation6 + $0xc4] sm:$0xf0]  ;;  %v839_v13 = vld [vmem:[#allocation6 + $0x50] sm:$0xf]  ;;  %v972_v14 = vld [vmem:[#allocation6 + $0x54] sm:$0xf0] }
  0x2e   :  { %v971_v15 = vld [vmem:[#allocation6 + $0x54] sm:$0xf]  ;;  %v985_v16 = vld [vmem:[#allocation6 + $0xc4] sm:$0xf]  ;;  %v897_v17 = vld [vmem:[#allocation6 + $0xc8] sm:$0xf0]  ;;  %v840_v19 = vor.u32 %v972_v14, %v839_v13  ;;  %v896_v22 = vor.u32 %v986_v11, %v895_v10 }
  0x2f   :  { %344 = vmatpush.bf16.msra.mxu2 %v672_v36  ;;  %v841_v18 = vld [vmem:[#allocation6 + $0x58] sm:$0xf0]  ;;  %v831_v21 = vld [vmem:[#allocation6 + $0x40] sm:$0xf]  ;;  %v970_v23 = vld [vmem:[#allocation6 + $0x44] sm:$0xf0]  ;;  %v900_v26 = vor.u32 %v985_v16, %v897_v17 }
  0x30   :  { %369 = vmatpush.bf16.msrb.mxu0 %v684_v29  ;;  %v844_v20 = vor.u32 %v971_v15, %v841_v18  ;;  %v969_v24 = vld [vmem:[#allocation6 + $0x44] sm:$0xf]  ;;  %v833_v25 = vld [vmem:[#allocation6 + $0x48] sm:$0xf0]  ;;  %v887_v27 = vld [vmem:[#allocation6 + $0xb0] sm:$0xf]  ;;  %v832_v31 = vor.u32 %v970_v23, %v831_v21 }
  0x31   :  { %382 = vmatpush.bf16.msrb.mxu1 %v748_v32  ;;  %357 = vmatpush.bf16.msra.mxu3 %v736_v40  ;;  %v984_v28 = vld [vmem:[#allocation6 + $0xb4] sm:$0xf0]  ;;  %v983_v29 = vld [vmem:[#allocation6 + $0xb4] sm:$0xf]  ;;  %v889_v30 = vld [vmem:[#allocation6 + $0xb8] sm:$0xf0]  ;;  %v836_v32 = vor.u32 %v969_v24, %v833_v25 }
  0x32   :  { %v888_v33 = vor.u32 %v984_v28, %v887_v27  ;;  %v892_v34 = vor.u32 %v983_v29, %v889_v30  ;;  %v879_v35 = vld [vmem:[#allocation6 + $0xa0] sm:$0xf]  ;;  %v982_v36 = vld [vmem:[#allocation6 + $0xa4] sm:$0xf0]  ;;  %v981_v38 = vld [vmem:[#allocation6 + $0xa4] sm:$0xf] }
  0x33   :  { %591 = vmatpush.bf16.msrb.mxu2 %v856_v61  ;;  %v79_v37 = vld [vmem:[%s1150_s2] sm:$0x3]  ;;  %v881_v39 = vld [vmem:[#allocation6 + $0xa8] sm:$0xf0]  ;;  %v880_v40 = vor.u32 %v982_v36, %v879_v35  ;;  %v823_v54 = vld [vmem:[#allocation6 + $0x30] sm:$0xf] }
  0x34   :  { %370 = vmatpush.bf16.msrb.mxu0 %v676_v41  ;;  %v81_v41 = vperm.slane %v79_v37, 0  ;;  %v884_v42 = vor.u32 %v981_v38, %v881_v39  ;;  %v82_v43 = vperm.slane %v79_v37, 1  ;;  %v968_v55 = vld [vmem:[#allocation6 + $0x34] sm:$0xf0]  ;;  %v825_v58 = vld [vmem:[#allocation6 + $0x38] sm:$0xf0] }
  0x35   :  { %383 = vmatpush.bf16.msrb.mxu1 %v740_v44  ;;  %604 = vmatpush.bf16.msrb.mxu3 %v920_v48  ;;  %v824_v57 = vor.u32 %v968_v55, %v823_v54  ;;  %v980_v61 = vld [vmem:[#allocation6 + $0x94] sm:$0xf0]  ;;  %v873_v0 = vld [vmem:[#allocation6 + $0x98] sm:$0xf0]  ;;  %v815_v2 = vld [vmem:[#allocation6 + $0x20] sm:$0xf] }
  0x36   :  { %v966_v3 = vld [vmem:[#allocation6 + $0x24] sm:$0xf0]  ;;  %v965_v4 = vld [vmem:[#allocation6 + $0x24] sm:$0xf]  ;;  %v817_v6 = vld [vmem:[#allocation6 + $0x28] sm:$0xf0] }
  0x37   :  { %592 = vmatpush.bf16.msrb.mxu2 %v848_v5  ;;  %v816_v5 = vor.u32 %v966_v3, %v815_v2  ;;  %v820_v7 = vor.u32 %v965_v4, %v817_v6  ;;  %v977_v10 = vld [vmem:[#allocation6 + $0x84] sm:$0xf]  ;;  %v807_v14 = vld [vmem:[#allocation6 + $0x10] sm:$0xf]  ;;  %v964_v15 = vld [vmem:[#allocation6 + $0x14] sm:$0xf0] }
  0x38   :  { %617 = vmatpush.bf16.msra.mxu0 %v860_v62  ;;  %v979_v62 = vld [vmem:[#allocation6 + $0x94] sm:$0xf]  ;;  %v808_v16 = vor.u32 %v964_v15, %v807_v14  ;;  %v809_v18 = vld [vmem:[#allocation6 + $0x18] sm:$0xf0]  ;;  %v962_v21 = vld [vmem:[#allocation6 + $0x4] sm:$0xf0] }
  0x39   :  { %630 = vmatpush.bf16.msra.mxu1 %v924_v52  ;;  %605 = vmatpush.bf16.msrb.mxu3 %v912_v56  ;;  %v967_v56 = vld [vmem:[#allocation6 + $0x34] sm:$0xf]  ;;  %v876_v1 = vor.u32 %v979_v62, %v873_v0  ;;  %v801_v24 = vld [vmem:[#allocation6 + $0x8] sm:$0xf0] }
  0x3a   :  { %v828_v59 = vor.u32 %v967_v56, %v825_v58  ;;  %v963_v17 = vld [vmem:[#allocation6 + $0x14] sm:$0xf] }
  0x3b   :  { %593 = vmatpush.bf16.msrb.mxu2 %v840_v19  ;;  %v812_v19 = vor.u32 %v963_v17, %v809_v18 }
  0x3c   :  { %618 = vmatpush.bf16.msra.mxu0 %v852_v9  ;;  %v978_v9 = vld [vmem:[#allocation6 + $0x84] sm:$0xf0] }
  0x3d   :  { %631 = vmatpush.bf16.msra.mxu1 %v916_v60  ;;  %606 = vmatpush.bf16.msrb.mxu3 %v904_v8  ;;  %v871_v60 = vld [vmem:[#allocation6 + $0x90] sm:$0xf]  ;;  %v863_v8 = vld [vmem:[#allocation6 + $0x80] sm:$0xf] }
  0x3e   :  { %v872_v63 = vor.u32 %v980_v61, %v871_v60  ;;  %v864_v11 = vor.u32 %v978_v9, %v863_v8 }
  0x3f   :  { %594 = vmatpush.bf16.msrb.mxu2 %v832_v31 }
  0x40   :  { %619 = vmatpush.bf16.msra.mxu0 %v844_v20  ;;  %v799_v20 = vld [vmem:[#allocation6] sm:$0xf] }
  0x41   :  { %632 = vmatpush.bf16.msra.mxu1 %v908_v12  ;;  %607 = vmatpush.bf16.msrb.mxu3 %v896_v22  ;;  %v865_v12 = vld [vmem:[#allocation6 + $0x88] sm:$0xf0]  ;;  %v961_v22 = vld [vmem:[#allocation6 + $0x4] sm:$0xf]  ;;  %v800_v23 = vor.u32 %v962_v21, %v799_v20 }
  0x42   :  { %v868_v13 = vor.u32 %v977_v10, %v865_v12  ;;  %v804_v25 = vor.u32 %v961_v22, %v801_v24 }
  0x43   :  { %595 = vmatpush.bf16.msrb.mxu2 %v824_v57 }
  0x44   :  { %620 = vmatpush.bf16.msra.mxu0 %v836_v32 }
  0x45   :  { %633 = vmatpush.bf16.msra.mxu1 %v900_v26  ;;  %608 = vmatpush.bf16.msrb.mxu3 %v888_v33  ;;  %v169_v26 = vld [vmem:[%s1152_s4] sm:$0x3] }
  0x46   :  { %v174_v27 = vperm.slane %v169_v26, 1  ;;  %v173_v32 = vperm.slane %v169_v26, 0 }
  0x47   :  { %596 = vmatpush.bf16.msrb.mxu2 %v816_v5 }
  0x48   :  { %621 = vmatpush.bf16.msra.mxu0 %v828_v59 }
  0x49   :  { %634 = vmatpush.bf16.msra.mxu1 %v892_v34  ;;  %609 = vmatpush.bf16.msrb.mxu3 %v880_v40 }
  0x4b   :  { %597 = vmatpush.bf16.msrb.mxu2 %v808_v16 }
  0x4c   :  { %622 = vmatpush.bf16.msra.mxu0 %v820_v7 }
  0x4d   :  { %635 = vmatpush.bf16.msra.mxu1 %v884_v42  ;;  %610 = vmatpush.bf16.msrb.mxu3 %v872_v63 }
  0x4f   :  { %598 = vmatpush.bf16.msrb.mxu2 %v800_v23 }
  0x50   :  { %623 = vmatpush.bf16.msra.mxu0 %v812_v19 }
  0x51   :  { %636 = vmatpush.bf16.msra.mxu1 %v876_v1  ;;  %611 = vmatpush.bf16.msrb.mxu3 %v864_v11 }
  0x54   :  { %624 = vmatpush.bf16.msra.mxu0 %v804_v25 }
  0x55   :  { %637 = vmatpush.bf16.msra.mxu1 %v868_v13 }
  0x94   :  { %v118_v44 = vpop.f32.mrf.mxu0 }
  0x95   :  { %v119_v45 = vadd.f32 %v118_v44, %v81_v41  ;;  %v131_v46 = vpop.f32.mrf.mxu1 }
  0x96   :  { %v132_v47 = vadd.f32 %v131_v46, %v82_v43  ;;  %v423_v46 = vld [vmem:[%s1154_s6] sm:$0x3] }
  0x97   :  { %v135_v48 = vmax.f32 %v119_v45, 0.0 }
  0x98   :  { %v136_v49 = vmax.f32 %v132_v47, 0.0  ;;  %v428_v47 = vperm.slane %v423_v46, 1 }
  0x99   :  { %v170_v50 = vpack.c.bf16 %v135_v48, %v135_v48 }
  0x9a   :  { %v171_v51 = vpack.c.bf16 %v136_v49, %v136_v49 }
  0x9b   :  { %345 = vmatmul.bf16.vlgmr.msra.gmra.mxu2 %v170_v50  ;;  %371 = vmatmul.bf16.vlgmr.msrb.gmra.mxu0 %v170_v50 }
  0x9c   :  { %358 = vmatmul.bf16.vlgmr.msra.gmra.mxu3 %v171_v51  ;;  %384 = vmatmul.bf16.vlgmr.msrb.gmra.mxu1 %v171_v51  ;;  %v120_v52 = vpop.f32.mrf.mxu0 }
  0x9d   :  { %v133_v53 = vpop.f32.mrf.mxu1 }
  0x9e   :  { %v427_v53 = vperm.slane %v423_v46, 0 }
 0x118   :  { %v372_v28 = vpop.f32.mrf.mxu0 }
 0x119   :  { %v373_v29 = vadd.f32 %v372_v28, %v174_v27  ;;  %v385_v30 = vpop.f32.mrf.mxu1 }
 0x11b   :  { %v386_v31 = vadd.f32 %v385_v30, %v373_v29 }
 0x11d   :  { %v390_v33 = vmax.f32 %v386_v31, 0.0 }
 0x11e   :  { %v346_v34 = vpop.f32.mrf.mxu2 }
 0x11f   :  { %v425_v35 = vpack.c.bf16 %v390_v33, %v390_v33  ;;  %v347_v36 = vadd.f32 %v346_v34, %v173_v32  ;;  %v359_v37 = vpop.f32.mrf.mxu3 }
 0x120   :  { %v374_v38 = vpop.f32.mrf.mxu0 }
 0x121   :  { %v360_v39 = vadd.f32 %v359_v37, %v347_v36  ;;  %v387_v40 = vpop.f32.mrf.mxu1  ;;  %612 = vmatmul.bf16.vlgmr.msrb.gmra.mxu3 %v425_v35  ;;  %638 = vmatmul.bf16.vlgmr.msra.gmra.mxu1 %v425_v35 }
 0x123   :  { %v389_v41 = vmax.f32 %v360_v39, 0.0 }
 0x125   :  { %v424_v42 = vpack.c.bf16 %v389_v41, %v389_v41 }
 0x126   :  { %v348_v43 = vpop.f32.mrf.mxu2 }
 0x127   :  { %v361_v44 = vpop.f32.mrf.mxu3  ;;  %599 = vmatmul.bf16.vlgmr.msrb.gmra.mxu2 %v424_v42  ;;  %625 = vmatmul.bf16.vlgmr.msra.gmra.mxu0 %v424_v42 }
 0x19e   :  { %v639_v45 = vpop.f32.mrf.mxu1 }
 0x1a4   :  { %v613_v48 = vpop.f32.mrf.mxu3  ;;  %v626_v49 = vpop.f32.mrf.mxu0 }
 0x1a5   :  { %v627_v50 = vadd.f32 %v626_v49, %v428_v47 }
 0x1a6   :  { %v641_v51 = vpop.f32.mrf.mxu1 }
 0x1a7   :  { %v640_v52 = vadd.f32 %v639_v45, %v627_v50 }
 0x1a9   :  { %644 = vst [vmem:[%s1155_s7 + $0x8] sm:$0xff] %v640_v52 }
 0x1aa   :  { %v600_v54 = vpop.f32.mrf.mxu2 }
 0x1ab   :  { %v601_v55 = vadd.f32 %v600_v54, %v427_v53 }
 0x1ac   :  { %v615_v56 = vpop.f32.mrf.mxu3  ;;  %v628_v57 = vpop.f32.mrf.mxu0 }
 0x1ad   :  { %v614_v58 = vadd.f32 %v613_v48, %v601_v55 }
 0x1af   :  { %643 = vst [vmem:[%s1155_s7] sm:$0xff] %v614_v58 }
 0x1b2   :  { %v602_v59 = vpop.f32.mrf.mxu2 }
 0x1b3   :  { %649 = vsyncpa [#allocation3], 1 }
 0x1b4   :  { %650 = vsyncpa [#allocation5], 1 }

// kernel: _mlp_forward_impl.1
= control target key start
LH: loop header
LB: loop body
LE: loop exit
PB: predicated region body
PF: predicated region fallthrough
CT: control target
= control target key end

     0   :  { %12 = vsyncpa [#allocation3], 0  ;;  %s1148_s0 = inlined_call_operand.vmem [shape: bf16[8,32], index: 0, kind: input, shape index: {}]   ;;  %s1149_s1 = inlined_call_operand.hbm [shape: bf16[32,256], index: 1, kind: input, shape index: {}]   ;;  %s1150_s2 = inlined_call_operand.vmem [shape: f32[1,256], index: 2, kind: input, shape index: {}]   ;;  %s1151_s3 = inlined_call_operand.hbm [shape: bf16[256,256], index: 3, kind: input, shape index: {}]   ;;  %s1152_s4 = inlined_call_operand.vmem [shape: f32[1,256], index: 4, kind: input, shape index: {}]   ;;  %s1153_s5 = inlined_call_operand.hbm [shape: bf16[256,256], index: 5, kind: input, shape index: {}]   ;;  %s1154_s6 = inlined_call_operand.vmem [shape: f32[1,256], index: 6, kind: input, shape index: {}]   ;;  %s1155_s7 = inlined_call_operand.vmem [shape: f32[8,256], index: 7, kind: output, shape index: {}]  }
   0x1   :  { %13 = vsyncpa [#allocation5], 0  ;;  %s35_s26 = sshll.u32 %s1151_s3, 4  ;;  %s1074_s27 = smov [#allocation4]   ;;  %s36_s26 = int_to_ptr.hbm [resolvable:$true] %s35_s26 }
   0x2   :  { %s37_s28 = sshll.u32 %s1074_s27, 4  ;;  %s20_s8 = sshll.u32 %s1149_s1, 4  ;;  %s38_s28 = int_to_ptr.vmem [resolvable:$true] %s37_s28  ;;  %s21_s8 = int_to_ptr.hbm [resolvable:$true] %s20_s8 }
   0x3   :  { %s1075_s9 = smov 128   ;;  %s1076_s10 = smov 8  }
   0x4   :  { %43 = dma.hbm_to_vmem [thread:$0]  %s36_s26, 4096, %s38_s28, [#allocation5], %s1075_s9, %s1075_s9, %s1076_s10  }
   0x5   :  { %s1077_s11 = smov [#allocation2]   ;;  %s50_s15 = sshll.u32 %s1153_s5, 4  ;;  %s51_s15 = int_to_ptr.hbm [resolvable:$true] %s50_s15 }
   0x6   :  { %s22_s12 = sshll.u32 %s1077_s11, 4  ;;  %s1078_s3 = smov [#allocation6]   ;;  %s23_s12 = int_to_ptr.vmem [resolvable:$true] %s22_s12 }
   0x7   :  { %28 = dma.hbm_to_vmem [thread:$0]  %s21_s8, 512, %s23_s12, [#allocation3], %s1075_s9, %s1075_s9, %s1076_s10  }
   0x8   :  { %s52_s16 = sshll.u32 %s1078_s3, 4  ;;  %s53_s16 = int_to_ptr.vmem [resolvable:$true] %s52_s16 }
   0x9   :  { %58 = dma.hbm_to_vmem [thread:$0]  %s51_s15, 4096, %s53_s16, [#allocation5], %s1075_s9, %s1075_s9, %s1076_s10  }
   0xa   :  { %1070 = dma.done.wait [#allocation3], 512  }
   0xb   :  { %1071 = vsyncadd [#allocation3], 4294966784 }
   0xc   :  { %1072 = dma.done.wait [#allocation5], 8192  }
   0xd   :  { %1073 = vsyncadd [#allocation5], 4294959104  ;;  %v661_v0 = vld [vmem:[#allocation2 + $0x10] sm:$0xf]  ;;  %v928_v1 = vld [vmem:[#allocation2 + $0x14] sm:$0xf0] }
   0xe   :  { %v927_v2 = vld [vmem:[#allocation2 + $0x14] sm:$0xf]  ;;  %v662_v3 = vor.u32 %v928_v1, %v661_v0  ;;  %v663_v4 = vld [vmem:[#allocation2 + $0x18] sm:$0xf0]  ;;  %v653_v5 = vld [vmem:[#allocation2] sm:$0xf] }
   0xf   :  { %v926_v6 = vld [vmem:[#allocation2 + $0x4] sm:$0xf0]  ;;  %v666_v7 = vor.u32 %v927_v2, %v663_v4  ;;  %v925_v8 = vld [vmem:[#allocation2 + $0x4] sm:$0xf]  ;;  %v655_v9 = vld [vmem:[#allocation2 + $0x8] sm:$0xf0] }
  0x10   :  { %vm105_vm0 = vcmask 261120   ;;  %115 = vmatpush.bf16.msra.mxu0 %v662_v3  ;;  %v654_v10 = vor.u32 %v926_v6, %v653_v5  ;;  %v727_v11 = vld [vmem:[#allocation4 + $0x70] sm:$0xf]  ;;  %v944_v12 = vld [vmem:[#allocation4 + $0x74] sm:$0xf0]  ;;  %v658_v14 = vor.u32 %v925_v8, %v655_v9 }
  0x11   :  { %v791_v13 = vld [vmem:[#allocation4 + $0xf0] sm:$0xf]  ;;  %128 = vmatpush.bf16.msra.mxu1 %v666_v7  ;;  %v728_v15 = vor.u32 %v944_v12, %v727_v11  ;;  %v960_v16 = vld [vmem:[#allocation4 + $0xf4] sm:$0xf0]  ;;  %v943_v17 = vld [vmem:[#allocation4 + $0x74] sm:$0xf] }
  0x12   :  { %v729_v18 = vld [vmem:[#allocation4 + $0x78] sm:$0xf0]  ;;  %v74_v19 = vld [vmem:[%s1148_s0] sm:$0xf]  ;;  %v792_v20 = vor.u32 %v960_v16, %v791_v13  ;;  %v959_v22 = vld [vmem:[#allocation4 + $0xf4] sm:$0xf] }
  0x13   :  { %v732_v21 = vor.u32 %v943_v17, %v729_v18  ;;  %v793_v23 = vld [vmem:[#allocation4 + $0xf8] sm:$0xf0]  ;;  %v719_v24 = vld [vmem:[#allocation4 + $0x60] sm:$0xf]  ;;  %337 = vmatpush.bf16.msra.mxu2 %v728_v15  ;;  %v942_v26 = vld [vmem:[#allocation4 + $0x64] sm:$0xf0] }
  0x14   :  { %v796_v25 = vor.u32 %v959_v22, %v793_v23  ;;  %v783_v27 = vld [vmem:[#allocation4 + $0xe0] sm:$0xf]  ;;  %v958_v28 = vld [vmem:[#allocation4 + $0xe4] sm:$0xf0]  ;;  %116 = vmatpush.bf16.msra.mxu0 %v654_v10  ;;  %350 = vmatpush.bf16.msra.mxu3 %v792_v20  ;;  %v720_v29 = vor.u32 %v942_v26, %v719_v24  ;;  %v941_v31 = vld [vmem:[#allocation4 + $0x64] sm:$0xf] }
  0x15   :  { %v784_v30 = vor.u32 %v958_v28, %v783_v27  ;;  %v721_v32 = vld [vmem:[#allocation4 + $0x68] sm:$0xf0]  ;;  %v957_v33 = vld [vmem:[#allocation4 + $0xe4] sm:$0xf]  ;;  %129 = vmatpush.bf16.msra.mxu1 %v658_v14  ;;  %v711_v36 = vld [vmem:[#allocation4 + $0x50] sm:$0xf] }
  0x16   :  { %v724_v34 = vor.u32 %v941_v31, %v721_v32  ;;  %v785_v35 = vld [vmem:[#allocation4 + $0xe8] sm:$0xf0]  ;;  %v940_v37 = vld [vmem:[#allocation4 + $0x54] sm:$0xf0]  ;;  %v775_v39 = vld [vmem:[#allocation4 + $0xd0] sm:$0xf] }
  0x17   :  { %v788_v38 = vor.u32 %v957_v33, %v785_v35  ;;  %v956_v40 = vld [vmem:[#allocation4 + $0xd4] sm:$0xf0]  ;;  %v939_v41 = vld [vmem:[#allocation4 + $0x54] sm:$0xf]  ;;  %667 = vmatmul.msk.bf16.vlgmr.msra.gmra.mxu0 %vm105_vm0, %v74_v19  ;;  %338 = vmatpush.bf16.msra.mxu2 %v720_v29  ;;  %v712_v42 = vor.u32 %v940_v37, %v711_v36  ;;  %v713_v43 = vld [vmem:[#allocation4 + $0x58] sm:$0xf0] }
  0x18   :  { %363 = vmatpush.bf16.msrb.mxu0 %v732_v21  ;;  %v955_v44 = vld [vmem:[#allocation4 + $0xd4] sm:$0xf]  ;;  %v777_v45 = vld [vmem:[#allocation4 + $0xd8] sm:$0xf0]  ;;  %668 = vmatmul.msk.bf16.vlgmr.msra.gmra.mxu1 %vm105_vm0, %v74_v19  ;;  %v776_v46 = vor.u32 %v956_v40, %v775_v39  ;;  %v703_v47 = vld [vmem:[#allocation4 + $0x40] sm:$0xf]  ;;  %v716_v49 = vor.u32 %v939_v41, %v713_v43 }
  0x19   :  { %376 = vmatpush.bf16.msrb.mxu1 %v796_v25  ;;  %351 = vmatpush.bf16.msra.mxu3 %v784_v30  ;;  %v938_v48 = vld [vmem:[#allocation4 + $0x44] sm:$0xf0]  ;;  %v767_v50 = vld [vmem:[#allocation4 + $0xc0] sm:$0xf]  ;;  %v780_v52 = vor.u32 %v955_v44, %v777_v45  ;;  %v937_v53 = vld [vmem:[#allocation4 + $0x44] sm:$0xf] }
  0x1a   :  { %v954_v51 = vld [vmem:[#allocation4 + $0xc4] sm:$0xf0]  ;;  %v705_v54 = vld [vmem:[#allocation4 + $0x48] sm:$0xf0]  ;;  %v704_v55 = vor.u32 %v938_v48, %v703_v47  ;;  %v953_v56 = vld [vmem:[#allocation4 + $0xc4] sm:$0xf] }
  0x1b   :  { %339 = vmatpush.bf16.msra.mxu2 %v712_v42  ;;  %v769_v57 = vld [vmem:[#allocation4 + $0xc8] sm:$0xf0]  ;;  %v768_v58 = vor.u32 %v954_v51, %v767_v50  ;;  %v695_v59 = vld [vmem:[#allocation4 + $0x30] sm:$0xf]  ;;  %v936_v60 = vld [vmem:[#allocation4 + $0x34] sm:$0xf0]  ;;  %v708_v61 = vor.u32 %v937_v53, %v705_v54 }
  0x1c   :  { %364 = vmatpush.bf16.msrb.mxu0 %v724_v34  ;;  %v759_v62 = vld [vmem:[#allocation4 + $0xb0] sm:$0xf]  ;;  %v952_v63 = vld [vmem:[#allocation4 + $0xb4] sm:$0xf0]  ;;  %v772_v0 = vor.u32 %v953_v56, %v769_v57  ;;  %v935_v1 = vld [vmem:[#allocation4 + $0x34] sm:$0xf]  ;;  %v696_v3 = vor.u32 %v936_v60, %v695_v59 }
  0x1d   :  { %377 = vmatpush.bf16.msrb.mxu1 %v788_v38  ;;  %352 = vmatpush.bf16.msra.mxu3 %v776_v46  ;;  %v697_v2 = vld [vmem:[#allocation4 + $0x38] sm:$0xf0]  ;;  %v951_v4 = vld [vmem:[#allocation4 + $0xb4] sm:$0xf]  ;;  %v760_v6 = vor.u32 %v952_v63, %v759_v62  ;;  %v687_v7 = vld [vmem:[#allocation4 + $0x20] sm:$0xf] }
  0x1e   :  { %v761_v5 = vld [vmem:[#allocation4 + $0xb8] sm:$0xf0]  ;;  %v934_v8 = vld [vmem:[#allocation4 + $0x24] sm:$0xf0]  ;;  %v700_v9 = vor.u32 %v935_v1, %v697_v2  ;;  %v751_v10 = vld [vmem:[#allocation4 + $0xa0] sm:$0xf] }
  0x1f   :  { %340 = vmatpush.bf16.msra.mxu2 %v704_v55  ;;  %v950_v11 = vld [vmem:[#allocation4 + $0xa4] sm:$0xf0]  ;;  %v764_v12 = vor.u32 %v951_v4, %v761_v5  ;;  %v933_v13 = vld [vmem:[#allocation4 + $0x24] sm:$0xf]  ;;  %v689_v14 = vld [vmem:[#allocation4 + $0x28] sm:$0xf0]  ;;  %v688_v15 = vor.u32 %v934_v8, %v687_v7 }
  0x20   :  { %365 = vmatpush.bf16.msrb.mxu0 %v716_v49  ;;  %v949_v16 = vld [vmem:[#allocation4 + $0xa4] sm:$0xf]  ;;  %v753_v17 = vld [vmem:[#allocation4 + $0xa8] sm:$0xf0]  ;;  %v752_v18 = vor.u32 %v950_v11, %v751_v10  ;;  %v692_v19 = vor.u32 %v933_v13, %v689_v14  ;;  %v679_v21 = vld [vmem:[#allocation4 + $0x10] sm:$0xf] }
  0x21   :  { %378 = vmatpush.bf16.msrb.mxu1 %v780_v52  ;;  %353 = vmatpush.bf16.msra.mxu3 %v768_v58  ;;  %v756_v20 = vor.u32 %v949_v16, %v753_v17  ;;  %v932_v22 = vld [vmem:[#allocation4 + $0x14] sm:$0xf0]  ;;  %v743_v23 = vld [vmem:[#allocation4 + $0x90] sm:$0xf]  ;;  %v931_v26 = vld [vmem:[#allocation4 + $0x14] sm:$0xf] }
  0x22   :  { %v680_v24 = vor.u32 %v932_v22, %v679_v21  ;;  %v948_v25 = vld [vmem:[#allocation4 + $0x94] sm:$0xf0]  ;;  %v681_v27 = vld [vmem:[#allocation4 + $0x18] sm:$0xf0]  ;;  %v947_v30 = vld [vmem:[#allocation4 + $0x94] sm:$0xf] }
  0x23   :  { %341 = vmatpush.bf16.msra.mxu2 %v696_v3  ;;  %v744_v28 = vor.u32 %v948_v25, %v743_v23  ;;  %v684_v29 = vor.u32 %v931_v26, %v681_v27  ;;  %v745_v31 = vld [vmem:[#allocation4 + $0x98] sm:$0xf0]  ;;  %v671_v33 = vld [vmem:[#allocation4] sm:$0xf]  ;;  %v930_v34 = vld [vmem:[#allocation4 + $0x4] sm:$0xf0] }
  0x24   :  { %366 = vmatpush.bf16.msrb.mxu0 %v708_v61  ;;  %v748_v32 = vor.u32 %v947_v30, %v745_v31  ;;  %v735_v35 = vld [vmem:[#allocation4 + $0x80] sm:$0xf]  ;;  %v672_v36 = vor.u32 %v930_v34, %v671_v33  ;;  %v946_v37 = vld [vmem:[#allocation4 + $0x84] sm:$0xf0]  ;;  %v929_v38 = vld [vmem:[#allocation4 + $0x4] sm:$0xf] }
  0x25   :  { %379 = vmatpush.bf16.msrb.mxu1 %v772_v0  ;;  %354 = vmatpush.bf16.msra.mxu3 %v760_v6  ;;  %v673_v39 = vld [vmem:[#allocation4 + $0x8] sm:$0xf0]  ;;  %v736_v40 = vor.u32 %v946_v37, %v735_v35  ;;  %v945_v42 = vld [vmem:[#allocation4 + $0x84] sm:$0xf]  ;;  %v919_v45 = vld [vmem:[#allocation6 + $0xf0] sm:$0xf] }
  0x26   :  { %v676_v41 = vor.u32 %v929_v38, %v673_v39  ;;  %v737_v43 = vld [vmem:[#allocation4 + $0x88] sm:$0xf0]  ;;  %v992_v46 = vld [vmem:[#allocation6 + $0xf4] sm:$0xf0]  ;;  %v991_v47 = vld [vmem:[#allocation6 + $0xf4] sm:$0xf] }
  0x27   :  { %342 = vmatpush.bf16.msra.mxu2 %v688_v15  ;;  %v740_v44 = vor.u32 %v945_v42, %v737_v43  ;;  %v920_v48 = vor.u32 %v992_v46, %v919_v45  ;;  %v921_v49 = vld [vmem:[#allocation6 + $0xf8] sm:$0xf0]  ;;  %v911_v50 = vld [vmem:[#allocation6 + $0xe0] sm:$0xf]  ;;  %v990_v51 = vld [vmem:[#allocation6 + $0xe4] sm:$0xf0] }
  0x28   :  { %367 = vmatpush.bf16.msrb.mxu0 %v700_v9  ;;  %v924_v52 = vor.u32 %v991_v47, %v921_v49  ;;  %v989_v53 = vld [vmem:[#allocation6 + $0xe4] sm:$0xf]  ;;  %v913_v54 = vld [vmem:[#allocation6 + $0xe8] sm:$0xf0]  ;;  %v855_v55 = vld [vmem:[#allocation6 + $0x70] sm:$0xf]  ;;  %v912_v56 = vor.u32 %v990_v51, %v911_v50 }
  0x29   :  { %380 = vmatpush.bf16.msrb.mxu1 %v764_v12  ;;  %355 = vmatpush.bf16.msra.mxu3 %v752_v18  ;;  %v976_v57 = vld [vmem:[#allocation6 + $0x74] sm:$0xf0]  ;;  %v975_v58 = vld [vmem:[#allocation6 + $0x74] sm:$0xf]  ;;  %v857_v59 = vld [vmem:[#allocation6 + $0x78] sm:$0xf0]  ;;  %v916_v60 = vor.u32 %v989_v53, %v913_v54 }
  0x2a   :  { %v856_v61 = vor.u32 %v976_v57, %v855_v55  ;;  %v860_v62 = vor.u32 %v975_v58, %v857_v59  ;;  %v903_v63 = vld [vmem:[#allocation6 + $0xd0] sm:$0xf]  ;;  %v988_v0 = vld [vmem:[#allocation6 + $0xd4] sm:$0xf0]  ;;  %v987_v1 = vld [vmem:[#allocation6 + $0xd4] sm:$0xf] }
  0x2b   :  { %343 = vmatpush.bf16.msra.mxu2 %v680_v24  ;;  %v905_v2 = vld [vmem:[#allocation6 + $0xd8] sm:$0xf0]  ;;  %v847_v3 = vld [vmem:[#allocation6 + $0x60] sm:$0xf]  ;;  %v974_v4 = vld [vmem:[#allocation6 + $0x64] sm:$0xf0]  ;;  %v904_v8 = vor.u32 %v988_v0, %v903_v63 }
  0x2c   :  { %368 = vmatpush.bf16.msrb.mxu0 %v692_v19  ;;  %v848_v5 = vor.u32 %v974_v4, %v847_v3  ;;  %v973_v6 = vld [vmem:[#allocation6 + $0x64] sm:$0xf]  ;;  %v849_v7 = vld [vmem:[#allocation6 + $0x68] sm:$0xf0]  ;;  %v895_v10 = vld [vmem:[#allocation6 + $0xc0] sm:$0xf]  ;;  %v908_v12 = vor.u32 %v987_v1, %v905_v2 }
  0x2d   :  { %381 = vmatpush.bf16.msrb.mxu1 %v756_v20  ;;  %356 = vmatpush.bf16.msra.mxu3 %v744_v28  ;;  %v852_v9 = vor.u32 %v973_v6, %v849_v7  ;;  %v986_v11 = vld [vmem:[#allocation6 + $0xc4] sm:$0xf0]  ;;  %v839_v13 = vld [vmem:[#allocation6 + $0x50] sm:$0xf]  ;;  %v972_v14 = vld [vmem:[#allocation6 + $0x54] sm:$0xf0] }
  0x2e   :  { %v971_v15 = vld [vmem:[#allocation6 + $0x54] sm:$0xf]  ;;  %v985_v16 = vld [vmem:[#allocation6 + $0xc4] sm:$0xf]  ;;  %v897_v17 = vld [vmem:[#allocation6 + $0xc8] sm:$0xf0]  ;;  %v840_v19 = vor.u32 %v972_v14, %v839_v13  ;;  %v896_v22 = vor.u32 %v986_v11, %v895_v10 }
  0x2f   :  { %344 = vmatpush.bf16.msra.mxu2 %v672_v36  ;;  %v841_v18 = vld [vmem:[#allocation6 + $0x58] sm:$0xf0]  ;;  %v831_v21 = vld [vmem:[#allocation6 + $0x40] sm:$0xf]  ;;  %v970_v23 = vld [vmem:[#allocation6 + $0x44] sm:$0xf0]  ;;  %v900_v26 = vor.u32 %v985_v16, %v897_v17 }
  0x30   :  { %369 = vmatpush.bf16.msrb.mxu0 %v684_v29  ;;  %v844_v20 = vor.u32 %v971_v15, %v841_v18  ;;  %v969_v24 = vld [vmem:[#allocation6 + $0x44] sm:$0xf]  ;;  %v833_v25 = vld [vmem:[#allocation6 + $0x48] sm:$0xf0]  ;;  %v887_v27 = vld [vmem:[#allocation6 + $0xb0] sm:$0xf]  ;;  %v832_v31 = vor.u32 %v970_v23, %v831_v21 }
  0x31   :  { %382 = vmatpush.bf16.msrb.mxu1 %v748_v32  ;;  %357 = vmatpush.bf16.msra.mxu3 %v736_v40  ;;  %v984_v28 = vld [vmem:[#allocation6 + $0xb4] sm:$0xf0]  ;;  %v983_v29 = vld [vmem:[#allocation6 + $0xb4] sm:$0xf]  ;;  %v889_v30 = vld [vmem:[#allocation6 + $0xb8] sm:$0xf0]  ;;  %v836_v32 = vor.u32 %v969_v24, %v833_v25 }
  0x32   :  { %v888_v33 = vor.u32 %v984_v28, %v887_v27  ;;  %v892_v34 = vor.u32 %v983_v29, %v889_v30  ;;  %v879_v35 = vld [vmem:[#allocation6 + $0xa0] sm:$0xf]  ;;  %v982_v36 = vld [vmem:[#allocation6 + $0xa4] sm:$0xf0]  ;;  %v981_v38 = vld [vmem:[#allocation6 + $0xa4] sm:$0xf] }
  0x33   :  { %591 = vmatpush.bf16.msrb.mxu2 %v856_v61  ;;  %v79_v37 = vld [vmem:[%s1150_s2] sm:$0x3]  ;;  %v881_v39 = vld [vmem:[#allocation6 + $0xa8] sm:$0xf0]  ;;  %v880_v40 = vor.u32 %v982_v36, %v879_v35  ;;  %v823_v54 = vld [vmem:[#allocation6 + $0x30] sm:$0xf] }
  0x34   :  { %370 = vmatpush.bf16.msrb.mxu0 %v676_v41  ;;  %v81_v41 = vperm.slane %v79_v37, 0  ;;  %v884_v42 = vor.u32 %v981_v38, %v881_v39  ;;  %v82_v43 = vperm.slane %v79_v37, 1  ;;  %v968_v55 = vld [vmem:[#allocation6 + $0x34] sm:$0xf0]  ;;  %v825_v58 = vld [vmem:[#allocation6 + $0x38] sm:$0xf0] }
  0x35   :  { %383 = vmatpush.bf16.msrb.mxu1 %v740_v44  ;;  %604 = vmatpush.bf16.msrb.mxu3 %v920_v48  ;;  %v824_v57 = vor.u32 %v968_v55, %v823_v54  ;;  %v980_v61 = vld [vmem:[#allocation6 + $0x94] sm:$0xf0]  ;;  %v873_v0 = vld [vmem:[#allocation6 + $0x98] sm:$0xf0]  ;;  %v815_v2 = vld [vmem:[#allocation6 + $0x20] sm:$0xf] }
  0x36   :  { %v966_v3 = vld [vmem:[#allocation6 + $0x24] sm:$0xf0]  ;;  %v965_v4 = vld [vmem:[#allocation6 + $0x24] sm:$0xf]  ;;  %v817_v6 = vld [vmem:[#allocation6 + $0x28] sm:$0xf0] }
  0x37   :  { %592 = vmatpush.bf16.msrb.mxu2 %v848_v5  ;;  %v816_v5 = vor.u32 %v966_v3, %v815_v2  ;;  %v820_v7 = vor.u32 %v965_v4, %v817_v6  ;;  %v977_v10 = vld [vmem:[#allocation6 + $0x84] sm:$0xf]  ;;  %v807_v14 = vld [vmem:[#allocation6 + $0x10] sm:$0xf]  ;;  %v964_v15 = vld [vmem:[#allocation6 + $0x14] sm:$0xf0] }
  0x38   :  { %617 = vmatpush.bf16.msra.mxu0 %v860_v62  ;;  %v979_v62 = vld [vmem:[#allocation6 + $0x94] sm:$0xf]  ;;  %v808_v16 = vor.u32 %v964_v15, %v807_v14  ;;  %v809_v18 = vld [vmem:[#allocation6 + $0x18] sm:$0xf0]  ;;  %v962_v21 = vld [vmem:[#allocation6 + $0x4] sm:$0xf0] }
  0x39   :  { %630 = vmatpush.bf16.msra.mxu1 %v924_v52  ;;  %605 = vmatpush.bf16.msrb.mxu3 %v912_v56  ;;  %v967_v56 = vld [vmem:[#allocation6 + $0x34] sm:$0xf]  ;;  %v876_v1 = vor.u32 %v979_v62, %v873_v0  ;;  %v801_v24 = vld [vmem:[#allocation6 + $0x8] sm:$0xf0] }
  0x3a   :  { %v828_v59 = vor.u32 %v967_v56, %v825_v58  ;;  %v963_v17 = vld [vmem:[#allocation6 + $0x14] sm:$0xf] }
  0x3b   :  { %593 = vmatpush.bf16.msrb.mxu2 %v840_v19  ;;  %v812_v19 = vor.u32 %v963_v17, %v809_v18 }
  0x3c   :  { %618 = vmatpush.bf16.msra.mxu0 %v852_v9  ;;  %v978_v9 = vld [vmem:[#allocation6 + $0x84] sm:$0xf0] }
  0x3d   :  { %631 = vmatpush.bf16.msra.mxu1 %v916_v60  ;;  %606 = vmatpush.bf16.msrb.mxu3 %v904_v8  ;;  %v871_v60 = vld [vmem:[#allocation6 + $0x90] sm:$0xf]  ;;  %v863_v8 = vld [vmem:[#allocation6 + $0x80] sm:$0xf] }
  0x3e   :  { %v872_v63 = vor.u32 %v980_v61, %v871_v60  ;;  %v864_v11 = vor.u32 %v978_v9, %v863_v8 }
  0x3f   :  { %594 = vmatpush.bf16.msrb.mxu2 %v832_v31 }
  0x40   :  { %619 = vmatpush.bf16.msra.mxu0 %v844_v20  ;;  %v799_v20 = vld [vmem:[#allocation6] sm:$0xf] }
  0x41   :  { %632 = vmatpush.bf16.msra.mxu1 %v908_v12  ;;  %607 = vmatpush.bf16.msrb.mxu3 %v896_v22  ;;  %v865_v12 = vld [vmem:[#allocation6 + $0x88] sm:$0xf0]  ;;  %v961_v22 = vld [vmem:[#allocation6 + $0x4] sm:$0xf]  ;;  %v800_v23 = vor.u32 %v962_v21, %v799_v20 }
  0x42   :  { %v868_v13 = vor.u32 %v977_v10, %v865_v12  ;;  %v804_v25 = vor.u32 %v961_v22, %v801_v24 }
  0x43   :  { %595 = vmatpush.bf16.msrb.mxu2 %v824_v57 }
  0x44   :  { %620 = vmatpush.bf16.msra.mxu0 %v836_v32 }
  0x45   :  { %633 = vmatpush.bf16.msra.mxu1 %v900_v26  ;;  %608 = vmatpush.bf16.msrb.mxu3 %v888_v33  ;;  %v169_v26 = vld [vmem:[%s1152_s4] sm:$0x3] }
  0x46   :  { %v174_v27 = vperm.slane %v169_v26, 1  ;;  %v173_v32 = vperm.slane %v169_v26, 0 }
  0x47   :  { %596 = vmatpush.bf16.msrb.mxu2 %v816_v5 }
  0x48   :  { %621 = vmatpush.bf16.msra.mxu0 %v828_v59 }
  0x49   :  { %634 = vmatpush.bf16.msra.mxu1 %v892_v34  ;;  %609 = vmatpush.bf16.msrb.mxu3 %v880_v40 }
  0x4b   :  { %597 = vmatpush.bf16.msrb.mxu2 %v808_v16 }
  0x4c   :  { %622 = vmatpush.bf16.msra.mxu0 %v820_v7 }
  0x4d   :  { %635 = vmatpush.bf16.msra.mxu1 %v884_v42  ;;  %610 = vmatpush.bf16.msrb.mxu3 %v872_v63 }
  0x4f   :  { %598 = vmatpush.bf16.msrb.mxu2 %v800_v23 }
  0x50   :  { %623 = vmatpush.bf16.msra.mxu0 %v812_v19 }
  0x51   :  { %636 = vmatpush.bf16.msra.mxu1 %v876_v1  ;;  %611 = vmatpush.bf16.msrb.mxu3 %v864_v11 }
  0x54   :  { %624 = vmatpush.bf16.msra.mxu0 %v804_v25 }
  0x55   :  { %637 = vmatpush.bf16.msra.mxu1 %v868_v13 }
  0x94   :  { %v118_v44 = vpop.f32.mrf.mxu0 }
  0x95   :  { %v119_v45 = vadd.f32 %v118_v44, %v81_v41  ;;  %v131_v46 = vpop.f32.mrf.mxu1 }
  0x96   :  { %v132_v47 = vadd.f32 %v131_v46, %v82_v43  ;;  %v423_v46 = vld [vmem:[%s1154_s6] sm:$0x3] }
  0x97   :  { %v135_v48 = vmax.f32 %v119_v45, 0.0 }
  0x98   :  { %v136_v49 = vmax.f32 %v132_v47, 0.0  ;;  %v428_v47 = vperm.slane %v423_v46, 1 }
  0x99   :  { %v170_v50 = vpack.c.bf16 %v135_v48, %v135_v48 }
  0x9a   :  { %v171_v51 = vpack.c.bf16 %v136_v49, %v136_v49 }
  0x9b   :  { %345 = vmatmul.bf16.vlgmr.msra.gmra.mxu2 %v170_v50  ;;  %371 = vmatmul.bf16.vlgmr.msrb.gmra.mxu0 %v170_v50 }
  0x9c   :  { %358 = vmatmul.bf16.vlgmr.msra.gmra.mxu3 %v171_v51  ;;  %384 = vmatmul.bf16.vlgmr.msrb.gmra.mxu1 %v171_v51  ;;  %v120_v52 = vpop.f32.mrf.mxu0 }
  0x9d   :  { %v133_v53 = vpop.f32.mrf.mxu1 }
  0x9e   :  { %v427_v53 = vperm.slane %v423_v46, 0 }
 0x118   :  { %v372_v28 = vpop.f32.mrf.mxu0 }
 0x119   :  { %v373_v29 = vadd.f32 %v372_v28, %v174_v27  ;;  %v385_v30 = vpop.f32.mrf.mxu1 }
 0x11b   :  { %v386_v31 = vadd.f32 %v385_v30, %v373_v29 }
 0x11d   :  { %v390_v33 = vmax.f32 %v386_v31, 0.0 }
 0x11e   :  { %v346_v34 = vpop.f32.mrf.mxu2 }
 0x11f   :  { %v425_v35 = vpack.c.bf16 %v390_v33, %v390_v33  ;;  %v347_v36 = vadd.f32 %v346_v34, %v173_v32  ;;  %v359_v37 = vpop.f32.mrf.mxu3 }
 0x120   :  { %v374_v38 = vpop.f32.mrf.mxu0 }
 0x121   :  { %v360_v39 = vadd.f32 %v359_v37, %v347_v36  ;;  %v387_v40 = vpop.f32.mrf.mxu1  ;;  %612 = vmatmul.bf16.vlgmr.msrb.gmra.mxu3 %v425_v35  ;;  %638 = vmatmul.bf16.vlgmr.msra.gmra.mxu1 %v425_v35 }
 0x123   :  { %v389_v41 = vmax.f32 %v360_v39, 0.0 }
 0x125   :  { %v424_v42 = vpack.c.bf16 %v389_v41, %v389_v41 }
 0x126   :  { %v348_v43 = vpop.f32.mrf.mxu2 }
 0x127   :  { %v361_v44 = vpop.f32.mrf.mxu3  ;;  %599 = vmatmul.bf16.vlgmr.msrb.gmra.mxu2 %v424_v42  ;;  %625 = vmatmul.bf16.vlgmr.msra.gmra.mxu0 %v424_v42 }
 0x19e   :  { %v639_v45 = vpop.f32.mrf.mxu1 }
 0x1a4   :  { %v613_v48 = vpop.f32.mrf.mxu3  ;;  %v626_v49 = vpop.f32.mrf.mxu0 }
 0x1a5   :  { %v627_v50 = vadd.f32 %v626_v49, %v428_v47 }
 0x1a6   :  { %v641_v51 = vpop.f32.mrf.mxu1 }
 0x1a7   :  { %v640_v52 = vadd.f32 %v639_v45, %v627_v50 }
 0x1a9   :  { %644 = vst [vmem:[%s1155_s7 + $0x8] sm:$0xff] %v640_v52 }
 0x1aa   :  { %v600_v54 = vpop.f32.mrf.mxu2 }
 0x1ab   :  { %v601_v55 = vadd.f32 %v600_v54, %v427_v53 }
 0x1ac   :  { %v615_v56 = vpop.f32.mrf.mxu3  ;;  %v628_v57 = vpop.f32.mrf.mxu0 }
 0x1ad   :  { %v614_v58 = vadd.f32 %v613_v48, %v601_v55 }
 0x1af   :  { %643 = vst [vmem:[%s1155_s7] sm:$0xff] %v614_v58 }
 0x1b2   :  { %v602_v59 = vpop.f32.mrf.mxu2 }
 0x1b3   :  { %649 = vsyncpa [#allocation3], 1 }
 0x1b4   :  { %650 = vsyncpa [#allocation5], 1 }

</bundles_post_ra>
